<compile_context>
chip_gen: v7x
topology: tpu7x:2x2x1
jax: 0.10.0
libtpu: 0.0.40
codegen_flags: <defaults>
</compile_context>

<pallas_src>
import math

import jax
import jax.numpy as jnp
from jax.experimental import pallas as pl
from jax.experimental.pallas import tpu as pltpu


def _linear_kernel(x_ref, w_ref, o_ref):
    # One MXU matmul per M-tile; f32 accumulation; cast only the stored result.
    o_ref[...] = jnp.dot(
        x_ref[...], w_ref[...], preferred_element_type=jnp.float32
    ).astype(o_ref.dtype)


def _round_up(x: int, mult: int) -> int:
    return ((x + mult - 1) // mult) * mult


def _choose_tile(m_rows: int, block_rows: int, align: int = 8) -> int:
    """Pick an M-tile: full-dim if it fits one block, else an aligned tile that
    yields an even number of tiles (balanced across v7x's two TensorCores)."""
    if m_rows <= block_rows:
        return m_rows  # single full-dim tile (legal even if not a multiple of 8)
    grid = pl.cdiv(m_rows, block_rows)
    if grid % 2 == 1:
        grid += 1  # even tile count -> balanced megacore split on v7x
    return _round_up(pl.cdiv(m_rows, grid), align)


def optimized_linear(
    inputs: jax.Array,
    weight: jax.Array,
    *,
    block_m: int = 8192,          # rows (un-packed) per tile; amortizes ~0.35us/step
    min_m_for_pallas: int = 4096,  # below this, XLA's fused dot wins on launch cost
    out_dtype=None,
    force_pallas: bool = False,
) -> jax.Array:
    """inputs: [..., in_features], weight: [in_features, out_features]."""
    in_features, out_features = weight.shape
    batch_shape = inputs.shape[:-1]
    m = math.prod(batch_shape) if batch_shape else 1

    if out_dtype is None:
        out_dtype = jnp.result_type(inputs.dtype, weight.dtype)
    out_dtype = jnp.dtype(out_dtype)

    # Tiny problems: pallas_call launch + pipeline prologue dominates; let XLA
    # handle it with a fused dot.
    if not force_pallas and m < min_m_for_pallas:
        return jnp.matmul(inputs, weight).astype(out_dtype)

    x2d = inputs.reshape(m, in_features)

    # Zero-byte-overhead lane packing: fold `pack` logical rows into one 128-lane
    # row with a block-diagonal weight.  Only when the reshapes are free views.
    pack = 128 // in_features if (in_features <= 128 and 128 % in_features == 0) else 1
    if pack > 1 and m % pack != 0:
        pack = 1  # fall back to the plain unpadded kernel (avoids padding copies)

    if pack > 1:
        k_eff = in_features * pack      # 128: fully lane-dense activation loads
        n_eff = out_features * pack     # 256: unmasked lane-dense output stores
        m_rows = m // pack
        x_kernel = x2d.reshape(m_rows, k_eff)                       # free view
        w_kernel = jnp.kron(jnp.eye(pack, dtype=weight.dtype), weight)  # (128, 256), 128 KiB
    else:
        k_eff, n_eff, m_rows = in_features, out_features, m
        x_kernel = x2d
        w_kernel = weight

    tm = _choose_tile(m_rows, max(1, block_m // pack))
    grid_m = pl.cdiv(m_rows, tm)

    # Honest scheduler hint: actual kernel work / traffic (weight streamed once).
    cost = pl.CostEstimate(
        flops=2 * m_rows * k_eff * n_eff,
        transcendentals=0,
        bytes_accessed=(
            m_rows * k_eff * jnp.dtype(x_kernel.dtype).itemsize
            + m_rows * n_eff * out_dtype.itemsize
            + k_eff * n_eff * jnp.dtype(w_kernel.dtype).itemsize
        ),
    )

    out2d = pl.pallas_call(
        _linear_kernel,
        out_shape=jax.ShapeDtypeStruct((m_rows, n_eff), out_dtype),
        grid_spec=pltpu.PrefetchScalarGridSpec(
            num_scalar_prefetch=0,
            grid=(grid_m,),
            in_specs=[
                # Streamed activations, default double-buffering.
                pl.BlockSpec((tm, k_eff), lambda i: (i, 0)),
                # Weight: constant block index -> DMA'd once, VMEM-resident.
                pl.BlockSpec((k_eff, n_eff), lambda i: (0, 0)),
            ],
            out_specs=pl.BlockSpec((tm, n_eff), lambda i: (i, 0)),
        ),
        compiler_params=pltpu.CompilerParams(
            # Row tiles are independent: shard across both TCs on v7x.
            dimension_semantics=("parallel",),
        ),
        cost_estimate=cost,
    )(x_kernel, w_kernel)

    # Free row-major views back to the logical shape (no HBM copy, no slice).
    return out2d.reshape(m, out_features).reshape(*batch_shape, out_features)


# TODO(synk): _load_from_state_dict weight-reshape logic is checkpoint plumbing,
# not part of the forward pass, so it has no kernel equivalent here.


if __name__ == "__main__":
    in_features, out_features = 32, 64
    weight_dtype = jnp.float32

    key = jax.random.PRNGKey(0)
    kx, kw, kx2, kx3 = jax.random.split(key, 4)
    # Deterministic parameter init (torch.empty is uninitialized; use normal init).
    weight = jax.random.normal(kw, (in_features, out_features), dtype=weight_dtype) * 0.02

    # 1) Module-sized small input (batch=2, seq=8): dispatches to the XLA fast path.
    batch, seq = 2, 8
    inputs = jax.random.normal(kx, (batch, seq, in_features), dtype=weight_dtype)
    ref_small = inputs @ weight
    out_small = jax.block_until_ready(optimized_linear(inputs, weight))
    assert out_small.shape == (batch, seq, out_features)
    assert jnp.allclose(out_small, ref_small, atol=1e-5, rtol=1e-5)

    # 2) Same small shape forced through the packed Pallas kernel (single full-dim tile).
    out_small_k = jax.block_until_ready(
        optimized_linear(inputs, weight, force_pallas=True)
    )
    assert out_small_k.shape == (batch, seq, out_features)
    assert jnp.allclose(out_small_k, ref_small, atol=1e-5, rtol=1e-5)

    # 3) Larger M (2560 rows) through the packed pipelined kernel with multiple
    #    tiles; tile count is forced even for a balanced megacore split.
    big_batch, big_seq = 4, 640
    big_inputs = jax.random.normal(
        kx2, (big_batch, big_seq, in_features), dtype=weight_dtype
    )
    ref_big = big_inputs @ weight
    out_big = jax.block_until_ready(
        optimized_linear(big_inputs, weight, block_m=1024, min_m_for_pallas=1024)
    )
    assert out_big.shape == (big_batch, big_seq, out_features)
    assert jnp.allclose(out_big, ref_big, atol=1e-5, rtol=1e-5)

    # 4) M not a multiple of 4 (m=1023) -> plain unpadded (K=32, N=64) fallback
    #    path with a partial tail tile (exercises Pallas block masking).
    odd_inputs = jax.random.normal(kx3, (3, 341, in_features), dtype=weight_dtype)
    ref_odd = odd_inputs @ weight
    out_odd = jax.block_until_ready(
        optimized_linear(odd_inputs, weight, force_pallas=True, block_m=512)
    )
    assert out_odd.shape == (3, 341, out_features)
    assert jnp.allclose(out_odd, ref_odd, atol=1e-5, rtol=1e-5)

    # 5) bf16 output path: native-dtype inputs into the MXU with f32 accumulation,
    #    only the stored result is bf16 (no wrapper-side cast pass).
    out_bf16 = jax.block_until_ready(
        optimized_linear(
            big_inputs, weight, out_dtype=jnp.bfloat16, block_m=1024, min_m_for_pallas=1024
        )
    )
    assert out_bf16.dtype == jnp.bfloat16
    assert jnp.allclose(out_bf16.astype(jnp.float32), ref_big, atol=2e-2, rtol=2e-2)

    print("KERNEL_OK")
</pallas_src>

<mosaic_0001>
module attributes {stable_mosaic.version = 11 : i64} {
  func.func @_linear_kernel(%arg0: i32, %arg1: memref<4x128xf32, #tpu.memory_space<vmem>>, %arg2: memref<128x256xf32, #tpu.memory_space<vmem>>, %arg3: memref<4x256xf32, #tpu.memory_space<vmem>>) attributes {dimension_semantics = [#tpu.dimension_semantics<parallel>], iteration_bounds = array<i64: 1>, scalar_prefetch = 0 : i64, scratch_operands = 0 : i64, tpu.core_type = #tpu.core_type<tc>, window_params = [{transform_indices = @transform_0, window_bounds = array<i64: 4, 128>}, {pipeline_mode = #tpu.pipeline_mode<synchronous>, transform_indices = @transform_1, window_bounds = array<i64: 128, 256>}, {transform_indices = @transform_2, window_bounds = array<i64: 4, 256>}]} {
    %c0 = arith.constant 0 : index
    %c0_0 = arith.constant 0 : index
    %0 = vector.load %arg1[%c0, %c0_0] : memref<4x128xf32, #tpu.memory_space<vmem>>, vector<4x128xf32>
    %c0_1 = arith.constant 0 : index
    %c0_2 = arith.constant 0 : index
    %1 = vector.load %arg2[%c0_1, %c0_2] : memref<128x256xf32, #tpu.memory_space<vmem>>, vector<128x256xf32>
    %cst = arith.constant dense<0.000000e+00> : vector<4x256xf32>
    %2 = tpu.matmul %0, %1, %cst {dimension_numbers = #tpu.dot_dimension_numbers<[1], [0], [0], [1], [0, 0, 1, 1], [], []>} : vector<4x128xf32>, vector<128x256xf32>, vector<4x256xf32> -> vector<4x256xf32>
    %c0_3 = arith.constant 0 : index
    %c0_4 = arith.constant 0 : index
    %3 = vector.load %arg3[%c0_3, %c0_4] : memref<4x256xf32, #tpu.memory_space<vmem>>, vector<4x256xf32>
    tpu.vector_store %arg3[%c0_3, %c0_4], %2 {strides = array<i32>} : memref<4x256xf32, #tpu.memory_space<vmem>>, vector<4x256xf32>,
    return
  }
  func.func @transform_0(%arg0: i32) -> (i32, i32) {
    %c0_i32 = arith.constant 0 : i32
    %c0_i32_0 = arith.constant 0 : i32
    return %arg0, %c0_i32 : i32, i32
  }
  func.func @transform_1(%arg0: i32) -> (i32, i32) {
    %c0_i32 = arith.constant 0 : i32
    %c0_i32_0 = arith.constant 0 : i32
    %c0_i32_1 = arith.constant 0 : i32
    return %c0_i32, %c0_i32_0 : i32, i32
  }
  func.func @transform_2(%arg0: i32) -> (i32, i32) {
    %c0_i32 = arith.constant 0 : i32
    %c0_i32_0 = arith.constant 0 : i32
    return %arg0, %c0_i32 : i32, i32
  }
}

</mosaic_0001>

<bundles_post_ra>
// kernel: tpu_custom_call.1
= control target key start
LH: loop header
LB: loop body
LE: loop exit
PB: predicated region body
PF: predicated region fallthrough
CT: control target
= control target key end

     0   :  { %7 = vsyncpa [#allocation3], 0  ;;  %s337_s0 = inlined_call_operand.hbm [shape: f32[4,128], index: 0, kind: input, shape index: {}]   ;;  %s338_s1 = inlined_call_operand.hbm [shape: f32[128,256], index: 1, kind: input, shape index: {}]   ;;  %s339_s2 = inlined_call_operand.hbm [shape: f32[4,256], index: 2, kind: output, shape index: {}]  }
   0x1   :  { %8 = vsyncpa [#allocation6], 0 }
   0x2   :  { %9 = vsyncpa [#allocation4], 0  ;;  %s273_s9 = smov [#allocation2]   ;;  %s274_s11 = smov [#allocation5]  }
   0x3   :  { %s16_s10 = sshll.u32 %s273_s9, 4  ;;  %s25_s12 = sshll.u32 %s274_s11, 4  ;;  %s17_s10 = int_to_ptr.vmem [resolvable:$true] %s16_s10  ;;  %s294_s12 = int_to_ptr.vmem [resolvable:$true] %s25_s12 }
   0x4   :  { %s201_s15 = scalar_lea.hbm %s337_s0, 64 }
   0x5   :  { %p202_p0 = scmp.ne.s32.totalorder %s337_s0, %s201_s15  ;;  %p205_p1 = scmp.lt.u32.totalorder %s201_s15, %s337_s0 }
   0x7   :  { %p207_p2 = pnand %p205_p1, %p202_p0 }
   0x9   :  { %210 = shalt.err (!%p207_p2)
}
   0xa   :  { %s211_s20 = scalar_lea.vmem %s17_s10, 64  ;;  %p216_p4 = scmp.lt.s32.totalorder %s17_s10, %s17_s10 }
   0xb   :  { %p212_p3 = scmp.ne.s32.totalorder %s17_s10, %s211_s20  ;;  %p217_p5 = scmp.lt.s32.totalorder %s211_s20, %s211_s20 }
   0xd   :  { %p218_p6 = por %p217_p5, %p216_p4 }
   0xf   :  { %p219_p7 = pnand %p218_p6, %p212_p3 }
  0x11   :  { %222 = shalt.err (!%p219_p7)
}
  0x12   :  { %19 = dma.hbm_to_vmem [thread:$0]  %s337_s0, 64, %s17_s10, [#allocation3]  }
  0x13   :  { %s223_s25 = scalar_lea.hbm %s338_s1, 4096 }
  0x14   :  { %p224_p8 = scmp.ne.s32.totalorder %s338_s1, %s223_s25  ;;  %p227_p9 = scmp.lt.u32.totalorder %s223_s25, %s338_s1 }
  0x16   :  { %p229_p10 = pnand %p227_p9, %p224_p8 }
  0x18   :  { %232 = shalt.err (!%p229_p10)
}
  0x19   :  { %s233_s30 = scalar_lea.vmem %s294_s12, 4096  ;;  %p238_p12 = scmp.lt.s32.totalorder %s294_s12, %s294_s12 }
  0x1a   :  { %p234_p11 = scmp.ne.s32.totalorder %s294_s12, %s233_s30  ;;  %p239_p13 = scmp.lt.s32.totalorder %s233_s30, %s233_s30 }
  0x1c   :  { %p240_p0 = por %p239_p13, %p238_p12 }
  0x1e   :  { %p241_p1 = pnand %p240_p0, %p234_p11 }
  0x20   :  { %244 = shalt.err (!%p241_p1)
}
  0x21   :  { %s275_s0 = smov 256   ;;  %s276_s3 = smov 16  }
  0x22   :  { %31 = dma.hbm_to_vmem [thread:$0]  %s338_s1, 4096, %s294_s12, [#allocation6], %s275_s0, %s275_s0, %s276_s3  }
  0x23   :  { %267 = dma.done.wait [#allocation3], 64  }
  0x24   :  { %268 = vsyncadd [#allocation3], 4294967232 }
  0x25   :  { %269 = dma.done.wait [#allocation6], 4096  }
  0x26   :  { %270 = vsyncadd [#allocation6], 4294963200  ;;  %v277_v0 = vmov 0.0   ;;  %v40_v1 = vld [vmem:[#allocation5 + $0x8] sm:$0xff]  ;;  %v42_v2 = vld [vmem:[#allocation5 + $0x18] sm:$0xff]  ;;  %s278_s1 = smov [#allocation7]  }
  0x27   :  { %135 = vmatprep.mubr.f32.mxu0 %v277_v0  ;;  %v39_v3 = vld [vmem:[#allocation5] sm:$0xff]  ;;  %v163_v4 = vpack.c.bf16 %v42_v2, %v40_v1  ;;  %v41_v5 = vld [vmem:[#allocation5 + $0x10] sm:$0xff]  ;;  %v44_v6 = vld [vmem:[#allocation5 + $0x28] sm:$0xff]  ;;  %s153_s6 = sshll.u32 %s278_s1, 4  ;;  %s154_s6 = int_to_ptr.vmem [resolvable:$true] %s153_s6 }
  0x28   :  { %v46_v7 = vld [vmem:[#allocation5 + $0x38] sm:$0xff]  ;;  %v165_v8 = vpack.c.bf16 %v41_v5, %v39_v3  ;;  %v43_v10 = vld [vmem:[#allocation5 + $0x20] sm:$0xff]  ;;  %v45_v11 = vld [vmem:[#allocation5 + $0x30] sm:$0xff]  ;;  %s245_s7 = scalar_lea.vmem %s154_s6, 128  ;;  %p250_p3 = scmp.lt.s32.totalorder %s154_s6, %s154_s6 }
  0x29   :  { %v167_v9 = vpack.c.bf16 %v46_v7, %v44_v6  ;;  %v48_v12 = vld [vmem:[#allocation5 + $0x48] sm:$0xff]  ;;  %164 = vmatprep.subr.bf16.mxu0 %v163_v4  ;;  %v50_v13 = vld [vmem:[#allocation5 + $0x58] sm:$0xff]  ;;  %v169_v14 = vpack.c.bf16 %v45_v11, %v43_v10  ;;  %v47_v16 = vld [vmem:[#allocation5 + $0x40] sm:$0xff]  ;;  %p246_p2 = scmp.ne.s32.totalorder %s154_s6, %s245_s7  ;;  %p251_p4 = scmp.lt.s32.totalorder %s245_s7, %s245_s7 }
  0x2a   :  { %166 = vmatpush1.bf16.msra.mxu0 %v165_v8  ;;  %v171_v15 = vpack.c.bf16 %v50_v13, %v48_v12  ;;  %v49_v17 = vld [vmem:[#allocation5 + $0x50] sm:$0xff]  ;;  %v52_v18 = vld [vmem:[#allocation5 + $0x68] sm:$0xff]  ;;  %v54_v19 = vld [vmem:[#allocation5 + $0x78] sm:$0xff] }
  0x2b   :  { %168 = vmatprep.subr.bf16.mxu0 %v167_v9  ;;  %v173_v20 = vpack.c.bf16 %v49_v17, %v47_v16  ;;  %v175_v21 = vpack.c.bf16 %v54_v19, %v52_v18  ;;  %v51_v22 = vld [vmem:[#allocation5 + $0x60] sm:$0xff]  ;;  %v53_v23 = vld [vmem:[#allocation5 + $0x70] sm:$0xff]  ;;  %v56_v24 = vld [vmem:[#allocation5 + $0x88] sm:$0xff]  ;;  %p252_p5 = por %p251_p4, %p250_p3 }
  0x2c   :  { %v58_v25 = vld [vmem:[#allocation5 + $0x98] sm:$0xff]  ;;  %v177_v26 = vpack.c.bf16 %v53_v23, %v51_v22  ;;  %v55_v28 = vld [vmem:[#allocation5 + $0x80] sm:$0xff]  ;;  %v57_v29 = vld [vmem:[#allocation5 + $0x90] sm:$0xff] }
  0x2d   :  { %v179_v27 = vpack.c.bf16 %v58_v25, %v56_v24  ;;  %v60_v30 = vld [vmem:[#allocation5 + $0xa8] sm:$0xff]  ;;  %v62_v31 = vld [vmem:[#allocation5 + $0xb8] sm:$0xff]  ;;  %v181_v32 = vpack.c.bf16 %v57_v29, %v55_v28  ;;  %v59_v34 = vld [vmem:[#allocation5 + $0xa0] sm:$0xff]  ;;  %p253_p6 = pnand %p252_p5, %p246_p2 }
  0x2e   :  { %170 = vmatpush1.bf16.msra.mxu0 %v169_v14  ;;  %v183_v33 = vpack.c.bf16 %v62_v31, %v60_v30  ;;  %v61_v35 = vld [vmem:[#allocation5 + $0xb0] sm:$0xff]  ;;  %v64_v36 = vld [vmem:[#allocation5 + $0xc8] sm:$0xff]  ;;  %v66_v37 = vld [vmem:[#allocation5 + $0xd8] sm:$0xff] }
  0x2f   :  { %172 = vmatprep.subr.bf16.mxu0 %v171_v15  ;;  %v185_v38 = vpack.c.bf16 %v61_v35, %v59_v34  ;;  %v187_v39 = vpack.c.bf16 %v66_v37, %v64_v36  ;;  %v63_v40 = vld [vmem:[#allocation5 + $0xc0] sm:$0xff]  ;;  %v65_v41 = vld [vmem:[#allocation5 + $0xd0] sm:$0xff]  ;;  %v68_v42 = vld [vmem:[#allocation5 + $0xe8] sm:$0xff] }
  0x30   :  { %v70_v43 = vld [vmem:[#allocation5 + $0xf8] sm:$0xff]  ;;  %v189_v44 = vpack.c.bf16 %v65_v41, %v63_v40  ;;  %v67_v46 = vld [vmem:[#allocation5 + $0xe0] sm:$0xff]  ;;  %v69_v47 = vld [vmem:[#allocation5 + $0xf0] sm:$0xff] }
  0x31   :  { %v191_v45 = vpack.c.bf16 %v70_v43, %v68_v42  ;;  %v193_v48 = vpack.c.bf16 %v69_v47, %v67_v46  ;;  %v38_v49 = vld [vmem:[#allocation2] sm:$0xf] }
  0x32   :  { %174 = vmatpush1.bf16.msra.mxu0 %v173_v20 }
  0x33   :  { %176 = vmatprep.subr.bf16.mxu0 %v175_v21 }
  0x36   :  { %178 = vmatpush1.bf16.msra.mxu0 %v177_v26 }
  0x37   :  { %180 = vmatprep.subr.bf16.mxu0 %v179_v27 }
  0x3a   :  { %182 = vmatpush1.bf16.msra.mxu0 %v181_v32 }
  0x3b   :  { %184 = vmatprep.subr.bf16.mxu0 %v183_v33 }
  0x3e   :  { %186 = vmatpush1.bf16.msra.mxu0 %v185_v38 }
  0x3f   :  { %188 = vmatprep.subr.bf16.mxu0 %v187_v39 }
  0x42   :  { %190 = vmatpush1.bf16.msra.mxu0 %v189_v44 }
  0x43   :  { %192 = vmatprep.subr.bf16.mxu0 %v191_v45 }
  0x46   :  { %194 = vmatpush1.bf16.msra.mxu0 %v193_v48 }
  0x49   :  { %136 = vmatmul.mubr.f32.vlgmr.msra.gmra.mrb[0].mxu0 %v38_v49 }
 0x11c   :  { %v137_v50 = vpop.f32.mrb[0].mxu0 }
 0x11d   :  { %v139_v51 = vpop.f32.mrb[1].mxu0 }
 0x11e   :  { %v144_v52 = vcombine.low %v137_v50, %v139_v51 }
 0x120   :  { %146 = vst [vmem:[#allocation7] sm:$0xff] %v144_v52 }
 0x121   :  { %256 = shalt.err (!%p253_p6)
}
 0x122   :  { %s257_s10 = scalar_lea.hbm %s339_s2, 128 }
 0x123   :  { %p258_p7 = scmp.ne.s32.totalorder %s339_s2, %s257_s10  ;;  %p261_p8 = scmp.lt.u32.totalorder %s257_s10, %s339_s2 }
 0x125   :  { %p263_p9 = pnand %p261_p8, %p258_p7 }
 0x127   :  { %266 = shalt.err (!%p263_p9)
}
 0x128   :  { %156 = dma.vmem_to_hbm [thread:$0]  %s154_s6, 128, %s339_s2, [#allocation4]  }
 0x129   :  { %271 = dma.done.wait [#allocation4], 128  }
 0x12a   :  { %272 = vsyncadd [#allocation4], 4294967168 }
 0x12b   :  { %160 = vsyncpa [#allocation3], 1 }
 0x12c   :  { %161 = vsyncpa [#allocation6], 1 }
 0x12d   :  { %162 = vsyncpa [#allocation4], 1 }

</bundles_post_ra>
